<compile_context>
chip_gen: v7x
topology: tpu7x:2x2x1
jax: 0.10.0
libtpu: 0.0.40
codegen_flags: <defaults>
</compile_context>

<pallas_src>
import functools
import math

import jax
import jax.numpy as jnp
from jax.experimental import pallas as pl
from jax.experimental.pallas import tpu as pltpu


# Weights larger than this (per fused kernel) fall back to the tiled path.
_FUSE_WEIGHT_BUDGET = 8 * 1024 * 1024   # bytes


# ----------------------------------------------------------------------------
# helpers
# ----------------------------------------------------------------------------
def _pick_tile(dim, target, base):
    """Largest tile <= target that divides `dim` and is a multiple of `base`.
    Falls back to the full dim (always legal for BlockSpec last-2 dims)."""
    if dim <= target:
        return dim
    t = (target // base) * base
    while t >= base:
        if dim % t == 0:
            return t
        t -= base
    return dim


def _layernorm_f32(y, g, b, eps):
    mean = jnp.mean(y, axis=-1, keepdims=True)
    c = y - mean
    var = jnp.mean(c * c, axis=-1, keepdims=True)
    inv = jax.lax.rsqrt(var + eps)
    return c * inv * g + b


# ----------------------------------------------------------------------------
# Kernel 1 (fallback): tiled linear  y = act(x @ W + b), pipelined, f32 acc
# ----------------------------------------------------------------------------
def _linear_kernel(x_ref, w_ref, b_ref, o_ref, acc_ref, *, activation):
    k = pl.program_id(2)

    @pl.when(k == 0)
    def _():
        acc_ref[...] = jnp.zeros_like(acc_ref)

    acc_ref[...] += jnp.dot(x_ref[...], w_ref[...],
                            preferred_element_type=jnp.float32)

    @pl.when(k == pl.num_programs(2) - 1)
    def _():
        y = acc_ref[...] + b_ref[...]
        if activation == "relu":
            y = jnp.maximum(y, 0.0)
        o_ref[...] = y.astype(o_ref.dtype)


def linear(x2d, w, b, *, activation=None, out_dtype=jnp.float32,
           compute_dtype=jnp.float32, tm_target=256, tn_target=256,
           tk_target=512):
    """x2d: (M, d_in), w: (d_in, d_out), b: (d_out,) -> (M, d_out)."""
    M, K = x2d.shape
    Kw, Nd = w.shape
    assert Kw == K
    tm = _pick_tile(M, tm_target, 8)
    tn = _pick_tile(Nd, tn_target, 128)   # lane-dense output stores
    tk = _pick_tile(K, tk_target, 128)
    kernel = functools.partial(_linear_kernel, activation=activation)
    return pl.pallas_call(
        kernel,
        out_shape=jax.ShapeDtypeStruct((M, Nd), out_dtype),
        grid=(M // tm, Nd // tn, K // tk),
        in_specs=[
            pl.BlockSpec((tm, tk), lambda i, j, k: (i, k)),
            pl.BlockSpec((tk, tn), lambda i, j, k: (k, j)),
            pl.BlockSpec((1, tn), lambda i, j, k: (0, j)),
        ],
        out_specs=pl.BlockSpec((tm, tn), lambda i, j, k: (i, j)),
        scratch_shapes=[pltpu.VMEM((tm, tn), jnp.float32)],
        compiler_params=pltpu.CompilerParams(
            dimension_semantics=("parallel", "parallel", "arbitrary")),
    )(x2d.astype(compute_dtype), w.astype(compute_dtype),
      b.reshape(1, Nd).astype(jnp.float32))


# ----------------------------------------------------------------------------
# Kernel 2: fused QKV projection (x read once, W = [Wq|Wk|Wv])
# ----------------------------------------------------------------------------
def _qkv_kernel(x_ref, w_ref, b_ref, q_ref, k_ref, v_ref, *, d_model):
    y = jnp.dot(x_ref[...], w_ref[...],
                preferred_element_type=jnp.float32) + b_ref[...]
    q_ref[...] = y[:, :d_model].astype(q_ref.dtype)
    k_ref[...] = y[:, d_model:2 * d_model].astype(k_ref.dtype)
    v_ref[...] = y[:, 2 * d_model:].astype(v_ref.dtype)


def qkv_projection(x2d, w_qkv, b_qkv, d_model, out_dtype):
    M, K = x2d.shape
    three = 3 * d_model
    tm = _pick_tile(M, 512, 8)
    kernel = functools.partial(_qkv_kernel, d_model=d_model)
    return pl.pallas_call(
        kernel,
        out_shape=tuple(jax.ShapeDtypeStruct((M, d_model), out_dtype)
                        for _ in range(3)),
        grid=(M // tm,),
        in_specs=[
            pl.BlockSpec((tm, K), lambda i: (i, 0)),
            pl.BlockSpec((K, three), lambda i: (0, 0)),   # stays resident
            pl.BlockSpec((1, three), lambda i: (0, 0)),
        ],
        out_specs=tuple(pl.BlockSpec((tm, d_model), lambda i: (i, 0))
                        for _ in range(3)),
        compiler_params=pltpu.CompilerParams(
            dimension_semantics=("parallel",)),
    )(x2d, w_qkv, b_qkv.reshape(1, three).astype(jnp.float32))


# ----------------------------------------------------------------------------
# Kernel 3: all-heads attention for one batch element per grid step.
# Optionally fuses output projection + residual add + LayerNorm1.
# ----------------------------------------------------------------------------
def _attn_kernel(*refs, n_heads, inv_scale, has_mask, fuse_out, eps):
    idx = 0
    q_ref = refs[idx]; idx += 1
    k_ref = refs[idx]; idx += 1
    v_ref = refs[idx]; idx += 1
    if has_mask:
        m_ref = refs[idx]; idx += 1
    if fuse_out:
        x_ref = refs[idx]; idx += 1
        wo_ref = refs[idx]; idx += 1
        bo_ref = refs[idx]; idx += 1
        g_ref = refs[idx]; idx += 1
        b_ref = refs[idx]; idx += 1
    o_ref = refs[idx]; idx += 1
    w_ref = refs[idx]; idx += 1

    d_model = q_ref.shape[2]
    D = d_model // n_heads

    q = q_ref[0] * jnp.asarray(inv_scale, dtype=q_ref.dtype)  # fold 1/scale
    k = k_ref[0]
    v = v_ref[0]

    # split heads in-register: (H, N, D) stacks of lane slices (no HBM transposes)
    qh = jnp.stack([q[:, h * D:(h + 1) * D] for h in range(n_heads)], axis=0)
    kh = jnp.stack([k[:, h * D:(h + 1) * D] for h in range(n_heads)], axis=0)
    vh = jnp.stack([v[:, h * D:(h + 1) * D] for h in range(n_heads)], axis=0)

    # scores for all heads at once: (H, N, N), f32 accumulation
    s = jnp.einsum("hnd,hmd->hnm", qh, kh,
                   preferred_element_type=jnp.float32)
    if has_mask:
        m = m_ref[0, 0]                                 # (N, N), 1.0 = masked
        s = jnp.where(m > 0.5, jnp.float32(-1e10), s)

    # softmax in f32 (VPU/EUP math stays f32 even on the bf16 MXU path)
    s = s - jnp.max(s, axis=-1, keepdims=True)
    p = jnp.exp(s)
    p = p * pl.reciprocal(jnp.sum(p, axis=-1, keepdims=True), approx=True)
    w_ref[0] = p.astype(w_ref.dtype)

    o = jnp.einsum("hnm,hmd->hnd", p.astype(v_ref.dtype), vh,
                   preferred_element_type=jnp.float32)   # (H, N, D)
    # merge heads -> (N, d_model); stays in VMEM
    merged = jnp.concatenate([o[h] for h in range(n_heads)], axis=-1)

    if not fuse_out:
        o_ref[0] = merged.astype(o_ref.dtype)
    else:
        attn = jnp.dot(merged.astype(wo_ref.dtype), wo_ref[...],
                       preferred_element_type=jnp.float32) + bo_ref[...]
        y = x_ref[0].astype(jnp.float32) + attn          # residual add
        o_ref[0] = _layernorm_f32(y, g_ref[...], b_ref[...],
                                  eps).astype(o_ref.dtype)


def attention(q, k, v, mask_f, n_heads, inv_scale, *, x=None, wo=None,
              bo=None, ln_g=None, ln_b=None, eps=1e-5):
    """q,k,v: (B, N, d_model); mask_f: None or (B,1,N,N) float (1.0 = masked).

    Returns (out, weights):
      * fused path (wo is not None): out = LayerNorm(x + (attn @ Wo + bo)), f32
      * plain path: out = merged attention heads, q.dtype
      weights: (B, H, N, N) f32.
    """
    B, N, d_model = q.shape
    has_mask = mask_f is not None
    fuse_out = wo is not None
    kernel = functools.partial(_attn_kernel, n_heads=n_heads,
                               inv_scale=inv_scale, has_mask=has_mask,
                               fuse_out=fuse_out, eps=eps)
    bnd_spec = pl.BlockSpec((1, N, d_model), lambda b: (b, 0, 0))
    vec_spec = pl.BlockSpec((1, d_model), lambda b: (0, 0))

    in_specs = [bnd_spec, bnd_spec, bnd_spec]
    inputs = [q, k, v]
    if has_mask:
        in_specs.append(pl.BlockSpec((1, 1, N, N), lambda b: (b, 0, 0, 0)))
        inputs.append(mask_f)
    if fuse_out:
        in_specs += [bnd_spec,
                     pl.BlockSpec((d_model, d_model), lambda b: (0, 0)),
                     vec_spec, vec_spec, vec_spec]
        inputs += [x, wo,
                   bo.reshape(1, d_model).astype(jnp.float32),
                   ln_g.reshape(1, d_model).astype(jnp.float32),
                   ln_b.reshape(1, d_model).astype(jnp.float32)]

    out_dtype = jnp.float32 if fuse_out else q.dtype
    return pl.pallas_call(
        kernel,
        out_shape=(
            jax.ShapeDtypeStruct((B, N, d_model), out_dtype),
            jax.ShapeDtypeStruct((B, n_heads, N, N), jnp.float32),
        ),
        grid=(B,),
        in_specs=in_specs,
        out_specs=(
            pl.BlockSpec((1, N, d_model), lambda b: (b, 0, 0)),
            pl.BlockSpec((1, n_heads, N, N), lambda b: (b, 0, 0, 0)),
        ),
        compiler_params=pltpu.CompilerParams(
            dimension_semantics=("parallel",)),
    )(*inputs)


# ----------------------------------------------------------------------------
# Kernel 4: fused FeedForward + residual + LayerNorm2
#   x2 = LayerNorm(x1 + (relu(x1 @ W1 + b1) @ W2 + b2))
# Weights stay resident; hidden (tm, d_ff) activation never touches HBM.
# ----------------------------------------------------------------------------
def _ffn_ln_kernel(x_ref, w1_ref, b1_ref, w2_ref, b2_ref, g_ref, b_ref,
                   o_ref, *, eps):
    x = x_ref[...].astype(jnp.float32)
    h = jnp.dot(x.astype(w1_ref.dtype), w1_ref[...],
                preferred_element_type=jnp.float32) + b1_ref[...]
    h = jnp.maximum(h, 0.0)
    ff = jnp.dot(h.astype(w2_ref.dtype), w2_ref[...],
                 preferred_element_type=jnp.float32) + b2_ref[...]
    y = x + ff
    o_ref[...] = _layernorm_f32(y, g_ref[...], b_ref[...],
                                eps).astype(o_ref.dtype)


def ffn_layernorm(x1_2d, w1, b1, w2, b2, gamma, beta, *, eps=1e-5,
                  tm_target=256):
    M, d_model = x1_2d.shape
    d_ff = w1.shape[1]
    tm = _pick_tile(M, tm_target, 8)
    return pl.pallas_call(
        functools.partial(_ffn_ln_kernel, eps=eps),
        out_shape=jax.ShapeDtypeStruct((M, d_model), jnp.float32),
        grid=(M // tm,),
        in_specs=[
            pl.BlockSpec((tm, d_model), lambda i: (i, 0)),
            pl.BlockSpec((d_model, d_ff), lambda i: (0, 0)),   # resident
            pl.BlockSpec((1, d_ff), lambda i: (0, 0)),
            pl.BlockSpec((d_ff, d_model), lambda i: (0, 0)),   # resident
            pl.BlockSpec((1, d_model), lambda i: (0, 0)),
            pl.BlockSpec((1, d_model), lambda i: (0, 0)),
            pl.BlockSpec((1, d_model), lambda i: (0, 0)),
        ],
        out_specs=pl.BlockSpec((tm, d_model), lambda i: (i, 0)),
        compiler_params=pltpu.CompilerParams(
            dimension_semantics=("parallel",)),
    )(x1_2d,
      w1, b1.reshape(1, d_ff).astype(jnp.float32),
      w2, b2.reshape(1, d_model).astype(jnp.float32),
      gamma.reshape(1, d_model).astype(jnp.float32),
      beta.reshape(1, d_model).astype(jnp.float32))


# ----------------------------------------------------------------------------
# Kernel 5 (fallback): fused residual add + LayerNorm (f32 math)
# ----------------------------------------------------------------------------
def _add_ln_kernel(x_ref, r_ref, g_ref, b_ref, o_ref, *, eps):
    y = x_ref[...].astype(jnp.float32) + r_ref[...].astype(jnp.float32)
    o_ref[...] = _layernorm_f32(y, g_ref[...], b_ref[...],
                                eps).astype(o_ref.dtype)


def add_layernorm(x, residual, gamma, beta, eps=1e-5):
    B, N, d_model = x.shape
    M = B * N
    tm = _pick_tile(M, 256, 8)
    return pl.pallas_call(
        functools.partial(_add_ln_kernel, eps=eps),
        out_shape=jax.ShapeDtypeStruct((M, d_model), jnp.float32),
        grid=(M // tm,),
        in_specs=[
            pl.BlockSpec((tm, d_model), lambda i: (i, 0)),
            pl.BlockSpec((tm, d_model), lambda i: (i, 0)),
            pl.BlockSpec((1, d_model), lambda i: (0, 0)),
            pl.BlockSpec((1, d_model), lambda i: (0, 0)),
        ],
        out_specs=pl.BlockSpec((tm, d_model), lambda i: (i, 0)),
        compiler_params=pltpu.CompilerParams(
            dimension_semantics=("parallel",)),
    )(x.reshape(M, d_model), residual.reshape(M, d_model),
      gamma.reshape(1, d_model).astype(jnp.float32),
      beta.reshape(1, d_model).astype(jnp.float32)
      ).reshape(B, N, d_model)


# ----------------------------------------------------------------------------
# EncoderLayer forward (glue in plain JAX, hot paths in Pallas)
# ----------------------------------------------------------------------------
def encoder_layer_forward(params, x, mask=None, *, n_heads,
                          compute_dtype=jnp.float32, fuse="auto"):
    B, N, d_model = x.shape
    assert d_model % n_heads == 0
    M = B * N
    inv_scale = 1.0 / math.sqrt(d_model / n_heads)
    itemsize = jnp.dtype(compute_dtype).itemsize

    # ----- fused QKV projection (x read once) -----
    x2d = x.reshape(M, d_model)
    xc = x2d.astype(compute_dtype)
    w_qkv = jnp.concatenate(
        [params["wq"], params["wk"], params["wv"]], axis=1).astype(compute_dtype)
    b_qkv = jnp.concatenate([params["bq"], params["bk"], params["bv"]])
    q, k, v = qkv_projection(xc, w_qkv, b_qkv, d_model, out_dtype=compute_dtype)
    q = q.reshape(B, N, d_model)
    k = k.reshape(B, N, d_model)
    v = v.reshape(B, N, d_model)

    mask_f = None
    if mask is not None:
        # PyTorch: attention_score[mask] = -1e10  (True = masked out)
        mask_f = jnp.broadcast_to(mask, (B, 1, N, N)).astype(jnp.float32)

    # ----- self attention (+ fused fc_o / residual / LN1 when it fits) -----
    if fuse == "auto":
        fuse_attn = d_model * d_model * itemsize <= _FUSE_WEIGHT_BUDGET
        fuse_ffn = 2 * d_model * params["w1"].shape[1] * itemsize \
            <= _FUSE_WEIGHT_BUDGET
    else:
        fuse_attn = fuse_ffn = bool(fuse)

    if fuse_attn:
        x1, attn_w = attention(
            q, k, v, mask_f, n_heads, inv_scale,
            x=x, wo=params["wo"].astype(compute_dtype), bo=params["bo"],
            ln_g=params["ln1_g"], ln_b=params["ln1_b"])
    else:
        attn_out, attn_w = attention(q, k, v, mask_f, n_heads, inv_scale)
        proj = linear(attn_out.reshape(M, d_model), params["wo"], params["bo"],
                      out_dtype=jnp.float32, compute_dtype=compute_dtype)
        x1 = add_layernorm(x, proj.reshape(B, N, d_model),
                           params["ln1_g"], params["ln1_b"])

    # Dropout is identity in eval/inference mode.
    # TODO(synk): training-mode dropout (RNG masking) not implemented.

    # ----- feed forward (+ residual + LN2) -----
    x1_2d = x1.reshape(M, d_model)
    if fuse_ffn:
        x2 = ffn_layernorm(
            x1_2d,
            params["w1"].astype(compute_dtype), params["b1"],
            params["w2"].astype(compute_dtype), params["b2"],
            params["ln2_g"], params["ln2_b"]).reshape(B, N, d_model)
    else:
        h = linear(x1_2d, params["w1"], params["b1"], activation="relu",
                   out_dtype=compute_dtype, compute_dtype=compute_dtype)
        ff = linear(h, params["w2"], params["b2"],
                    out_dtype=jnp.float32, compute_dtype=compute_dtype)
        x2 = add_layernorm(x1, ff.reshape(B, N, d_model),
                           params["ln2_g"], params["ln2_b"])
    return x2, attn_w


# ----------------------------------------------------------------------------
# Deterministic parameter init (nn.Linear / nn.LayerNorm defaults)
# ----------------------------------------------------------------------------
def init_params(key, d_model, d_ff):
    keys = jax.random.split(key, 12)

    def lin(kw, kb, d_in, d_out):
        lim = 1.0 / math.sqrt(d_in)
        w = jax.random.uniform(kw, (d_in, d_out), jnp.float32, -lim, lim)
        b = jax.random.uniform(kb, (d_out,), jnp.float32, -lim, lim)
        return w, b

    wq, bq = lin(keys[0], keys[1], d_model, d_model)
    wk, bk = lin(keys[2], keys[3], d_model, d_model)
    wv, bv = lin(keys[4], keys[5], d_model, d_model)
    wo, bo = lin(keys[6], keys[7], d_model, d_model)
    w1, b1 = lin(keys[8], keys[9], d_model, d_ff)
    w2, b2 = lin(keys[10], keys[11], d_ff, d_model)
    ones = jnp.ones((d_model,), jnp.float32)
    zeros = jnp.zeros((d_model,), jnp.float32)
    return dict(wq=wq, bq=bq, wk=wk, bk=bk, wv=wv, bv=bv, wo=wo, bo=bo,
                ln1_g=ones, ln1_b=zeros, w1=w1, b1=b1, w2=w2, b2=b2,
                ln2_g=ones, ln2_b=zeros)


# ----------------------------------------------------------------------------
# Pure-JAX reference (mirrors the PyTorch module exactly, eval mode)
# ----------------------------------------------------------------------------
def _layernorm_ref(y, g, b, eps=1e-5):
    mean = jnp.mean(y, axis=-1, keepdims=True)
    var = jnp.mean((y - mean) ** 2, axis=-1, keepdims=True)
    return (y - mean) / jnp.sqrt(var + eps) * g + b


def ref_encoder_layer(params, x, mask, n_heads):
    B, N, d_model = x.shape
    D = d_model // n_heads
    scale = jnp.sqrt(jnp.float32(d_model / n_heads))
    q = x @ params["wq"] + params["bq"]
    k = x @ params["wk"] + params["bk"]
    v = x @ params["wv"] + params["bv"]
    sh = lambda t: t.reshape(B, N, n_heads, D).transpose(0, 2, 1, 3)
    q, k, v = sh(q), sh(k), sh(v)
    s = jnp.einsum("bhnd,bhmd->bhnm", q, k) / scale
    if mask is not None:
        s = jnp.where(mask, -1e10, s)
    w = jax.nn.softmax(s, axis=-1)
    a = jnp.einsum("bhnm,bhmd->bhnd", w, v)
    a = a.transpose(0, 2, 1, 3).reshape(B, N, d_model)
    attn_out = a @ params["wo"] + params["bo"]
    x1 = _layernorm_ref(x + attn_out, params["ln1_g"], params["ln1_b"])
    h = jnp.maximum(x1 @ params["w1"] + params["b1"], 0.0)
    ff = h @ params["w2"] + params["b2"]
    x2 = _layernorm_ref(x1 + ff, params["ln2_g"], params["ln2_b"])
    return x2, w


if __name__ == "__main__":
    B, N, d_model, n_heads, d_ff = 2, 8, 32, 4, 64
    key = jax.random.PRNGKey(0)
    kx, kp = jax.random.split(key, 2)

    x = jax.random.normal(kx, (B, N, d_model), jnp.float32)
    params = init_params(kp, d_model, d_ff)

    # Padding-style encoder mask: True = masked (matches score[mask] = -1e10).
    valid_len = jnp.array([N, N - 3])
    key_pos = jnp.arange(N)
    enc_mask = (key_pos[None, :] >= valid_len[:, None])[:, None, None, :]

    # f32 MXU path: mask=None / masked, fused and fallback (tiled) code paths.
    for mask in (None, enc_mask):
        for fuse in ("auto", False):
            out, w = encoder_layer_forward(params, x, mask, n_heads=n_heads,
                                           compute_dtype=jnp.float32,
                                           fuse=fuse)
            jax.block_until_ready((out, w))
            ref_out, ref_w = ref_encoder_layer(params, x, mask, n_heads)
            assert jnp.allclose(out, ref_out, atol=2e-3, rtol=2e-3)
            assert jnp.allclose(w, ref_w, atol=2e-3, rtol=2e-3)

    # bf16 MXU inputs (v6e/v7x recommendation), f32 accumulation & softmax/LN.
    out_bf, w_bf = encoder_layer_forward(params, x, enc_mask, n_heads=n_heads,
                                         compute_dtype=jnp.bfloat16)
    jax.block_until_ready((out_bf, w_bf))
    ref_out, ref_w = ref_encoder_layer(params, x, enc_mask, n_heads)
    assert jnp.allclose(out_bf.astype(jnp.float32), ref_out, atol=1e-1, rtol=1e-1)
    assert jnp.allclose(w_bf, ref_w, atol=3e-2, rtol=3e-2)

    print("KERNEL_OK")
</pallas_src>

<mosaic_0001>
module attributes {stable_mosaic.version = 11 : i64} {
  func.func @_qkv_kernel(%arg0: i32, %arg1: memref<16x32xf32, #tpu.memory_space<vmem>>, %arg2: memref<32x96xf32, #tpu.memory_space<vmem>>, %arg3: memref<1x96xf32, #tpu.memory_space<vmem>>, %arg4: memref<16x32xf32, #tpu.memory_space<vmem>>, %arg5: memref<16x32xf32, #tpu.memory_space<vmem>>, %arg6: memref<16x32xf32, #tpu.memory_space<vmem>>) attributes {dimension_semantics = [#tpu.dimension_semantics<parallel>], iteration_bounds = array<i64: 1>, scalar_prefetch = 0 : i64, scratch_operands = 0 : i64, tpu.core_type = #tpu.core_type<tc>, window_params = [{transform_indices = @transform_0, window_bounds = array<i64: 16, 32>}, {pipeline_mode = #tpu.pipeline_mode<synchronous>, transform_indices = @transform_1, window_bounds = array<i64: 32, 96>}, {pipeline_mode = #tpu.pipeline_mode<synchronous>, transform_indices = @transform_2, window_bounds = array<i64: 1, 96>}, {transform_indices = @transform_3, window_bounds = array<i64: 16, 32>}, {transform_indices = @transform_4, window_bounds = array<i64: 16, 32>}, {transform_indices = @transform_5, window_bounds = array<i64: 16, 32>}]} {
    %c0 = arith.constant 0 : index
    %c0_0 = arith.constant 0 : index
    %0 = vector.load %arg1[%c0, %c0_0] : memref<16x32xf32, #tpu.memory_space<vmem>>, vector<16x32xf32>
    %c0_1 = arith.constant 0 : index
    %c0_2 = arith.constant 0 : index
    %1 = vector.load %arg2[%c0_1, %c0_2] : memref<32x96xf32, #tpu.memory_space<vmem>>, vector<32x96xf32>
    %cst = arith.constant dense<0.000000e+00> : vector<16x96xf32>
    %2 = tpu.matmul %0, %1, %cst {dimension_numbers = #tpu.dot_dimension_numbers<[1], [0], [0], [1], [0, 0, 1, 1], [], []>} : vector<16x32xf32>, vector<32x96xf32>, vector<16x96xf32> -> vector<16x96xf32>
    %c0_3 = arith.constant 0 : index
    %c0_4 = arith.constant 0 : index
    %3 = vector.load %arg3[%c0_3, %c0_4] : memref<1x96xf32, #tpu.memory_space<vmem>>, vector<1x96xf32>
    %4 = vector.broadcast %3 : vector<1x96xf32> to vector<16x96xf32>
    %5 = arith.addf %2, %4 : vector<16x96xf32>
    %6 = vector.extract_strided_slice %5 {offsets = [0, 0], sizes = [16, 32], strides = [1, 1]} : vector<16x96xf32> to vector<16x32xf32>
    %c0_5 = arith.constant 0 : index
    %c0_6 = arith.constant 0 : index
    %7 = vector.load %arg4[%c0_5, %c0_6] : memref<16x32xf32, #tpu.memory_space<vmem>>, vector<16x32xf32>
    tpu.vector_store %arg4[%c0_5, %c0_6], %6 {strides = array<i32>} : memref<16x32xf32, #tpu.memory_space<vmem>>, vector<16x32xf32>,
    %8 = vector.extract_strided_slice %5 {offsets = [0, 32], sizes = [16, 32], strides = [1, 1]} : vector<16x96xf32> to vector<16x32xf32>
    %c0_7 = arith.constant 0 : index
    %c0_8 = arith.constant 0 : index
    %9 = vector.load %arg5[%c0_7, %c0_8] : memref<16x32xf32, #tpu.memory_space<vmem>>, vector<16x32xf32>
    tpu.vector_store %arg5[%c0_7, %c0_8], %8 {strides = array<i32>} : memref<16x32xf32, #tpu.memory_space<vmem>>, vector<16x32xf32>,
    %10 = vector.extract_strided_slice %5 {offsets = [0, 64], sizes = [16, 32], strides = [1, 1]} : vector<16x96xf32> to vector<16x32xf32>
    %c0_9 = arith.constant 0 : index
    %c0_10 = arith.constant 0 : index
    %11 = vector.load %arg6[%c0_9, %c0_10] : memref<16x32xf32, #tpu.memory_space<vmem>>, vector<16x32xf32>
    tpu.vector_store %arg6[%c0_9, %c0_10], %10 {strides = array<i32>} : memref<16x32xf32, #tpu.memory_space<vmem>>, vector<16x32xf32>,
    return
  }
  func.func @transform_0(%arg0: i32) -> (i32, i32) {
    %c0_i32 = arith.constant 0 : i32
    %c0_i32_0 = arith.constant 0 : i32
    return %arg0, %c0_i32 : i32, i32
  }
  func.func @transform_1(%arg0: i32) -> (i32, i32) {
    %c0_i32 = arith.constant 0 : i32
    %c0_i32_0 = arith.constant 0 : i32
    %c0_i32_1 = arith.constant 0 : i32
    return %c0_i32, %c0_i32_0 : i32, i32
  }
  func.func @transform_2(%arg0: i32) -> (i32, i32) {
    %c0_i32 = arith.constant 0 : i32
    %c0_i32_0 = arith.constant 0 : i32
    %c0_i32_1 = arith.constant 0 : i32
    return %c0_i32, %c0_i32_0 : i32, i32
  }
  func.func @transform_3(%arg0: i32) -> (i32, i32) {
    %c0_i32 = arith.constant 0 : i32
    %c0_i32_0 = arith.constant 0 : i32
    return %arg0, %c0_i32 : i32, i32
  }
  func.func @transform_4(%arg0: i32) -> (i32, i32) {
    %c0_i32 = arith.constant 0 : i32
    %c0_i32_0 = arith.constant 0 : i32
    return %arg0, %c0_i32 : i32, i32
  }
  func.func @transform_5(%arg0: i32) -> (i32, i32) {
    %c0_i32 = arith.constant 0 : i32
    %c0_i32_0 = arith.constant 0 : i32
    return %arg0, %c0_i32 : i32, i32
  }
}

</mosaic_0001>

<bundles_post_ra>
// kernel: tpu_custom_call.1
= control target key start
LH: loop header
LB: loop body
LE: loop exit
PB: predicated region body
PF: predicated region fallthrough
CT: control target
= control target key end

     0   :  { %11 = vsyncpa [#allocation3], 0  ;;  %s498_s0 = inlined_call_operand.hbm [shape: f32[16,32], index: 0, kind: input, shape index: {}]   ;;  %s499_s1 = inlined_call_operand.hbm [shape: f32[32,96], index: 1, kind: input, shape index: {}]   ;;  %s500_s2 = inlined_call_operand.vmem [shape: f32[1,96], index: 2, kind: input, shape index: {}]   ;;  %s501_s3 = inlined_call_operand.hbm [shape: f32[16,32], index: 3, kind: output, shape index: {0}]   ;;  %s502_s4 = inlined_call_operand.hbm [shape: f32[16,32], index: 4, kind: output, shape index: {1}]   ;;  %s503_s5 = inlined_call_operand.hbm [shape: f32[16,32], index: 5, kind: output, shape index: {2}]  }
   0x1   :  { %12 = vsyncpa [#allocation6], 0 }
   0x2   :  { %13 = vsyncpa [#allocation4], 0 }
   0x3   :  { %14 = vsyncpa [#allocation9], 0  ;;  %s366_s18 = smov [#allocation2]   ;;  %s248_s22 = scalar_lea.hbm %s498_s0, 256 }
   0x4   :  { %s20_s19 = sshll.u32 %s366_s18, 4  ;;  %p249_p0 = scmp.ne.s32.totalorder %s498_s0, %s248_s22  ;;  %s21_s19 = int_to_ptr.vmem [resolvable:$true] %s20_s19 }
   0x5   :  { %p252_p1 = scmp.lt.u32.totalorder %s248_s22, %s498_s0 }
   0x7   :  { %p254_p2 = pnand %p252_p1, %p249_p0 }
   0x9   :  { %257 = shalt.err (!%p254_p2)
}
   0xa   :  { %s258_s27 = scalar_lea.vmem %s21_s19, 256  ;;  %p263_p4 = scmp.lt.s32.totalorder %s21_s19, %s21_s19 }
   0xb   :  { %p259_p3 = scmp.ne.s32.totalorder %s21_s19, %s258_s27  ;;  %p264_p5 = scmp.lt.s32.totalorder %s258_s27, %s258_s27 }
   0xd   :  { %p265_p6 = por %p264_p5, %p263_p4 }
   0xf   :  { %p266_p7 = pnand %p265_p6, %p259_p3 }
  0x11   :  { %269 = shalt.err (!%p266_p7)
}
  0x12   :  { %s367_s28 = smov 128   ;;  %s368_s29 = smov 8  }
  0x13   :  { %26 = dma.hbm_to_vmem [thread:$0]  %s498_s0, 256, %s21_s19, [#allocation3], %s367_s28, %s367_s28, %s368_s29  }
  0x14   :  { %s369_s7 = smov [#allocation5]   ;;  %s270_s11 = scalar_lea.hbm %s499_s1, 512 }
  0x15   :  { %s32_s8 = sshll.u32 %s369_s7, 4  ;;  %p271_p8 = scmp.ne.s32.totalorder %s499_s1, %s270_s11  ;;  %s33_s8 = int_to_ptr.vmem [resolvable:$true] %s32_s8 }
  0x16   :  { %p274_p9 = scmp.lt.u32.totalorder %s270_s11, %s499_s1 }
  0x18   :  { %p276_p10 = pnand %p274_p9, %p271_p8 }
  0x1a   :  { %279 = shalt.err (!%p276_p10)
}
  0x1b   :  { %s280_s16 = scalar_lea.vmem %s33_s8, 512  ;;  %p285_p12 = scmp.lt.s32.totalorder %s33_s8, %s33_s8 }
  0x1c   :  { %p281_p11 = scmp.ne.s32.totalorder %s33_s8, %s280_s16  ;;  %p286_p13 = scmp.lt.s32.totalorder %s280_s16, %s280_s16 }
  0x1e   :  { %p287_p0 = por %p286_p13, %p285_p12 }
  0x20   :  { %p288_p1 = pnand %p287_p0, %p281_p11 }
  0x22   :  { %291 = shalt.err (!%p288_p1)
}
  0x23   :  { %38 = dma.hbm_to_vmem [thread:$0]  %s499_s1, 512, %s33_s8, [#allocation6], %s367_s28, %s367_s28, %s368_s29  }
  0x24   :  { %358 = dma.done.wait [#allocation3], 256  }
  0x25   :  { %359 = vsyncadd [#allocation3], 4294967040 }
  0x26   :  { %360 = dma.done.wait [#allocation6], 512  }
  0x27   :  { %361 = vsyncadd [#allocation6], 4294966784  ;;  %vm60_vm0 = vcmask 261120   ;;  %v49_v0 = vld [vmem:[#allocation5] sm:$0xff]  ;;  %v50_v1 = vld [vmem:[#allocation5 + $0x8] sm:$0xff]  ;;  %s370_s19 = smov [#allocation7]  }
  0x28   :  { %v51_v2 = vld [vmem:[#allocation5 + $0x10] sm:$0xff]  ;;  %v231_v3 = vpack.c.bf16 %v50_v1, %v49_v0  ;;  %v52_v4 = vld [vmem:[#allocation5 + $0x18] sm:$0xff]  ;;  %s167_s20 = sshll.u32 %s370_s19, 4  ;;  %s371_s21 = smov 64   ;;  %s168_s20 = int_to_ptr.vmem [resolvable:$true] %s167_s20 }
  0x29   :  { %v47_v5 = vld [vmem:[#allocation2] sm:$0xff]  ;;  %v235_v6 = vpack.c.bf16 %v52_v4, %v51_v2  ;;  %v48_v7 = vld [vmem:[#allocation2 + $0x8] sm:$0xff]  ;;  %s372_s22 = smov 96   ;;  %s292_s23 = scalar_lea.vmem %s168_s20, 256 }
  0x2a   :  { %228 = vmatprep.mubr.msk.f32.mxu0 %vm60_vm0, %v47_v5  ;;  %232 = vmatprep.subr.bf16.mxu0 %v231_v3  ;;  %v211_v8 = vld [vmem:[%s500_s2] ss:$0 sm:$0xff]  ;;  %p293_p2 = scmp.ne.s32.totalorder %s168_s20, %s292_s23  ;;  %p297_p3 = scmp.lt.s32.totalorder %s168_s20, %s168_s20 }
  0x2b   :  { %234 = vmatpush3.bf16.msra.mxu0 %v231_v3  ;;  %p298_p4 = scmp.lt.s32.totalorder %s292_s23, %s292_s23 }
  0x2c   :  { %236 = vmatprep.subr.bf16.mxu0 %v235_v6 }
  0x2d   :  { %p299_p5 = por %p298_p4, %p297_p3 }
  0x2f   :  { %238 = vmatpush3.bf16.msra.mxu0 %v235_v6  ;;  %p300_p6 = pnand %p299_p5, %p293_p2 }
  0x32   :  { %229 = vmatmul.mubr.msk.f32.vlgmr.msra.gmra.mrb[0].mxu0 %vm60_vm0, %v48_v7 }
 0x105   :  { %v230_v9 = vpop.f32.mrb[0].mxu0 }
 0x106   :  { %v139_v10 = vadd.f32 %v230_v9, %v211_v8  ;;  %v133_v11 = vpop.f32.mrb[1].mxu0 }
 0x107   :  { %v134_v12 = vadd.f32 %v211_v8, %v133_v11 }
 0x108   :  { %143 = vst.msk [vmem:[#allocation7 + $0x8] sm:$0xff] %vm60_vm0, %v139_v10 }
 0x109   :  { %142 = vst.msk [vmem:[#allocation7] sm:$0xff] %vm60_vm0, %v134_v12  ;;  %154 = vrot.lane.b32.xlu1 %v134_v12, %s371_s21  ;;  %146 = vrot.lane.b32.xlu0 %v134_v12, %s372_s22 }
 0x10a   :  { %303 = shalt.err (!%p300_p6)
}
 0x10b   :  { %s304_s25 = scalar_lea.hbm %s501_s3, 256 }
 0x10c   :  { %p305_p7 = scmp.ne.s32.totalorder %s501_s3, %s304_s25  ;;  %p308_p8 = scmp.lt.u32.totalorder %s304_s25, %s501_s3 }
 0x10e   :  { %p310_p9 = pnand %p308_p8, %p305_p7 }
 0x110   :  { %313 = shalt.err (!%p310_p9)
}
 0x111   :  { %173 = dma.vmem_to_hbm [thread:$0]  %s168_s20, 256, %s501_s3, [#allocation4], %s367_s28, %s367_s28, %s368_s29  }
 0x112   :  { %156 = vrot.lane.b32.xlu1 %v139_v10, %s371_s21  ;;  %148 = vrot.lane.b32.xlu0 %v139_v10, %s372_s22  ;;  %s373_s9 = smov [#allocation8]   ;;  %s374_s11 = smov [#allocation10]  }
 0x113   :  { %s179_s10 = sshll.u32 %s373_s9, 4  ;;  %s191_s12 = sshll.u32 %s374_s11, 4  ;;  %s180_s10 = int_to_ptr.vmem [resolvable:$true] %s179_s10  ;;  %s459_s12 = int_to_ptr.vmem [resolvable:$true] %s191_s12 }
 0x114   :  { %s314_s3 = scalar_lea.vmem %s180_s10, 256  ;;  %p319_p11 = scmp.lt.s32.totalorder %s180_s10, %s180_s10 }
 0x115   :  { %p315_p10 = scmp.ne.s32.totalorder %s180_s10, %s314_s3  ;;  %p320_p12 = scmp.lt.s32.totalorder %s314_s3, %s314_s3 }
 0x117   :  { %p321_p13 = por %p320_p12, %p319_p11 }
 0x119   :  { %p322_p0 = pnand %p321_p13, %p315_p10 }
 0x17b   :  { %v155_v13 = vpop.permute.xlu1 %154  ;;  %v147_v14 = vpop.permute.xlu0 %146 }
 0x17c   :  { %160 = vst.msk [vmem:[#allocation10] sm:$0xff] %vm60_vm0, %v155_v13  ;;  %152 = vst.msk [vmem:[#allocation8] sm:$0xff] %vm60_vm0, %v147_v14 }
 0x184   :  { %v157_v15 = vpop.permute.xlu1 %156  ;;  %v149_v16 = vpop.permute.xlu0 %148 }
 0x185   :  { %161 = vst.msk [vmem:[#allocation10 + $0x8] sm:$0xff] %vm60_vm0, %v157_v15  ;;  %153 = vst.msk [vmem:[#allocation8 + $0x8] sm:$0xff] %vm60_vm0, %v149_v16 }
 0x186   :  { %325 = shalt.err (!%p322_p0)
}
 0x187   :  { %s326_s15 = scalar_lea.hbm %s502_s4, 256 }
 0x188   :  { %p327_p1 = scmp.ne.s32.totalorder %s502_s4, %s326_s15  ;;  %p330_p2 = scmp.lt.u32.totalorder %s326_s15, %s502_s4 }
 0x18a   :  { %p332_p3 = pnand %p330_p2, %p327_p1 }
 0x18c   :  { %335 = shalt.err (!%p332_p3)
}
 0x18d   :  { %185 = dma.vmem_to_hbm [thread:$0]  %s180_s10, 256, %s502_s4, [#allocation9], %s367_s28, %s367_s28, %s368_s29  }
 0x18e   :  { %s336_s20 = scalar_lea.vmem %s459_s12, 256  ;;  %p341_p5 = scmp.lt.s32.totalorder %s459_s12, %s459_s12 }
 0x18f   :  { %p337_p4 = scmp.ne.s32.totalorder %s459_s12, %s336_s20  ;;  %p342_p6 = scmp.lt.s32.totalorder %s336_s20, %s336_s20 }
 0x191   :  { %p343_p7 = por %p342_p6, %p341_p5 }
 0x193   :  { %p344_p8 = pnand %p343_p7, %p337_p4 }
 0x195   :  { %347 = shalt.err (!%p344_p8)
}
 0x196   :  { %s348_s23 = scalar_lea.hbm %s503_s5, 256 }
 0x197   :  { %p349_p9 = scmp.ne.s32.totalorder %s503_s5, %s348_s23  ;;  %p352_p10 = scmp.lt.u32.totalorder %s348_s23, %s503_s5 }
 0x199   :  { %p354_p11 = pnand %p352_p10, %p349_p9 }
 0x19b   :  { %357 = shalt.err (!%p354_p11)
}
 0x19c   :  { %197 = dma.vmem_to_hbm [thread:$0]  %s459_s12, 256, %s503_s5, [#allocation9], %s367_s28, %s367_s28, %s368_s29  }
 0x19d   :  { %362 = dma.done.wait [#allocation4], 256  }
 0x19e   :  { %363 = vsyncadd [#allocation4], 4294967040 }
 0x19f   :  { %364 = dma.done.wait [#allocation9], 512  }
 0x1a0   :  { %365 = vsyncadd [#allocation9], 4294966784 }
 0x1a1   :  { %207 = vsyncpa [#allocation3], 1 }
 0x1a2   :  { %208 = vsyncpa [#allocation6], 1 }
 0x1a3   :  { %209 = vsyncpa [#allocation4], 1 }
 0x1a4   :  { %210 = vsyncpa [#allocation9], 1 }

</bundles_post_ra>
